<compile_context>
chip_gen: v5e
topology: v5e:2x2
jax: 0.10.0
libtpu: 0.0.40
codegen_flags: <defaults>
</compile_context>

<pallas_src>
import functools

import jax
import jax.numpy as jnp
from jax.experimental import pallas as pl
from jax.experimental.pallas import tpu as pltpu


def _round_up(v, m):
    return (v + m - 1) // m * m


def _fc_kernel(seed_ref, x_ref, w_ref, b_ref, o_ref, acc_ref,
               *, dropout_rate, tile_m, tile_k):
    """One (i, j, k) grid step: acc += x_tile @ w_tile.T ; finalize adds bias."""
    i = pl.program_id(0)
    k = pl.program_id(2)
    nk = pl.num_programs(2)

    @pl.when(k == 0)
    def _():
        acc_ref[...] = jnp.zeros_like(acc_ref)

    x = x_ref[...]

    if dropout_rate is not None and dropout_rate > 0.0:
        # Inverted dropout with a stateless per-element hash PRNG (pure jnp ops,
        # works on TPU and in interpret mode; keyed by runtime seed + global
        # element coordinates so tiles get independent but reproducible masks).
        row_ids = (jax.lax.broadcasted_iota(jnp.int32, x.shape, 0)
                   + i * tile_m).astype(jnp.uint32)
        col_ids = (jax.lax.broadcasted_iota(jnp.int32, x.shape, 1)
                   + k * tile_k).astype(jnp.uint32)
        seed_u = seed_ref[0].astype(jnp.uint32)
        h = (row_ids * jnp.uint32(0x9E3779B1)
             + col_ids * jnp.uint32(0x85EBCA77)
             + seed_u * jnp.uint32(0xC2B2AE3D))
        h = h ^ (h >> 16)
        h = h * jnp.uint32(0x7FEB352D)
        h = h ^ (h >> 15)
        h = h * jnp.uint32(0x846CA68B)
        h = h ^ (h >> 16)
        # uniform in [0, 1) from the high 24 bits
        u = (h >> 8).astype(jnp.int32).astype(jnp.float32) * jnp.float32(1.0 / (1 << 24))
        keep = u >= jnp.float32(dropout_rate)
        scale = 1.0 / (1.0 - dropout_rate)
        x = jnp.where(keep, x * scale, jnp.zeros_like(x))

    # x: (tm, tk), w: (tn, tk) (PyTorch layout) -> contract the shared K axis.
    acc_ref[...] += jax.lax.dot_general(
        x, w_ref[...],
        dimension_numbers=(((1,), (1,)), ((), ())),
        preferred_element_type=jnp.float32,
        precision=jax.lax.Precision.HIGHEST,
    )

    @pl.when(k == nk - 1)
    def _():
        o_ref[...] = (acc_ref[...] + b_ref[...].astype(jnp.float32)).astype(o_ref.dtype)


def fc_layer_forward(x, weight, bias, dropout=None, seed=0):
    """Pallas implementation of FCLayer.forward.

    Args:
      x:       (batch, in_features)
      weight:  (num_classes, in_features)  -- PyTorch nn.Linear layout (no transpose)
      bias:    (num_classes,)
      dropout: optional float rate; training-mode inverted dropout applied to x
      seed:    runtime int seed (only used when dropout is not None)
    Returns:
      (batch, num_classes) in x.dtype
    """
    batch, in_features = x.shape
    num_classes, kdim = weight.shape
    assert kdim == in_features

    # Tile sizes: lane/sublane aligned, capped so double-buffered blocks stay
    # small (~3 MiB worst case) -> fits v7x's 64 MiB VMEM as well as v5e/v6e.
    tm = min(256, _round_up(batch, 8))
    tn = min(256, _round_up(num_classes, 128))   # lane-dense output stores
    tk = min(512, _round_up(in_features, 128))

    m_pad = _round_up(batch, tm)
    n_pad = _round_up(num_classes, tn)
    k_pad = _round_up(in_features, tk)

    xp = x
    if (m_pad, k_pad) != (batch, in_features):
        xp = jnp.pad(x, ((0, m_pad - batch), (0, k_pad - in_features)))
    wp = weight
    if (n_pad, k_pad) != (num_classes, in_features):
        wp = jnp.pad(weight, ((0, n_pad - num_classes), (0, k_pad - in_features)))
    bp = bias.reshape(1, num_classes)
    if n_pad != num_classes:
        bp = jnp.pad(bp, ((0, 0), (0, n_pad - num_classes)))

    grid = (m_pad // tm, n_pad // tn, k_pad // tk)
    seed_arr = jnp.asarray([seed], dtype=jnp.int32)   # runtime scalar, no recompiles

    kernel = functools.partial(_fc_kernel, dropout_rate=dropout,
                               tile_m=tm, tile_k=tk)

    itemsize = jnp.dtype(x.dtype).itemsize
    flops = 2 * m_pad * n_pad * k_pad
    bytes_accessed = (xp.size * itemsize * (n_pad // tn)
                      + wp.size * jnp.dtype(weight.dtype).itemsize * (m_pad // tm)
                      + bp.size * jnp.dtype(bias.dtype).itemsize
                      + m_pad * n_pad * itemsize)

    out = pl.pallas_call(
        kernel,
        out_shape=jax.ShapeDtypeStruct((m_pad, n_pad), x.dtype),
        grid_spec=pltpu.PrefetchScalarGridSpec(
            num_scalar_prefetch=1,
            grid=grid,
            in_specs=[
                pl.BlockSpec((tm, tk), lambda i, j, k, seed: (i, k)),   # x
                pl.BlockSpec((tn, tk), lambda i, j, k, seed: (j, k)),   # weight (N, K)
                pl.BlockSpec((1, tn), lambda i, j, k, seed: (0, j)),    # bias
            ],
            out_specs=pl.BlockSpec((tm, tn), lambda i, j, k, seed: (i, j)),
            scratch_shapes=[pltpu.VMEM((tm, tn), jnp.float32)],
        ),
        compiler_params=pltpu.CompilerParams(
            dimension_semantics=("parallel", "parallel", "arbitrary")),
        cost_estimate=pl.CostEstimate(flops=int(flops), transcendentals=0,
                                      bytes_accessed=int(bytes_accessed)),
    )(seed_arr, xp, wp, bp)

    if (m_pad, n_pad) != (batch, num_classes):
        out = out[:batch, :num_classes]
    return out


if __name__ == "__main__":
    # Shapes consistent with FCLayer(in_features, num_classes).
    batch, in_features, num_classes = 8, 32, 16

    key = jax.random.PRNGKey(0)
    kx, kw, kb = jax.random.split(key, 3)

    x = jax.random.normal(kx, (batch, in_features), dtype=jnp.float32)
    bound = 1.0 / (in_features ** 0.5)
    weight = jax.random.uniform(kw, (num_classes, in_features),
                                minval=-bound, maxval=bound, dtype=jnp.float32)
    bias = jax.random.uniform(kb, (num_classes,),
                              minval=-bound, maxval=bound, dtype=jnp.float32)

    # dropout=None path (eval / default FCLayer behaviour) -> exact reference.
    out = jax.block_until_ready(fc_layer_forward(x, weight, bias, dropout=None))
    ref = x @ weight.T + bias
    assert out.shape == (batch, num_classes)
    assert jnp.allclose(out, ref, atol=1e-5, rtol=1e-5)

    # Larger shape exercising multi-tile N and K grid axes + padding/slicing.
    b2, f2, c2 = 40, 640, 272
    ka, kb2, kc = jax.random.split(jax.random.PRNGKey(1), 3)
    x2 = jax.random.normal(ka, (b2, f2), dtype=jnp.float32)
    w2 = jax.random.normal(kb2, (c2, f2), dtype=jnp.float32) * 0.02
    bi2 = jax.random.normal(kc, (c2,), dtype=jnp.float32)
    out2 = jax.block_until_ready(fc_layer_forward(x2, w2, bi2, dropout=None))
    ref2 = x2 @ w2.T + bi2
    assert jnp.allclose(out2, ref2, atol=1e-4, rtol=1e-4)

    # Dropout path (training semantics): runs, is finite, and deterministic per seed.
    # TODO(synk): torch's RNG stream cannot be reproduced; this uses a JAX-side
    # hash PRNG with identical inverted-dropout semantics.
    o_a = jax.block_until_ready(fc_layer_forward(x, weight, bias, dropout=0.5, seed=123))
    o_b = jax.block_until_ready(fc_layer_forward(x, weight, bias, dropout=0.5, seed=123))
    assert o_a.shape == (batch, num_classes)
    assert bool(jnp.all(jnp.isfinite(o_a)))
    assert jnp.allclose(o_a, o_b)

    print("KERNEL_OK")
</pallas_src>

<mosaic_0001>
module attributes {stable_mosaic.version = 11 : i64} {
  func.func @_fc_kernel(%arg0: i32, %arg1: i32, %arg2: i32, %arg3: memref<1xi32, #tpu.memory_space<smem>>, %arg4: memref<8x128xf32, #tpu.memory_space<vmem>>, %arg5: memref<128x128xf32, #tpu.memory_space<vmem>>, %arg6: memref<1x128xf32, #tpu.memory_space<vmem>>, %arg7: memref<8x128xf32, #tpu.memory_space<vmem>>, %arg8: memref<8x128xf32, #tpu.memory_space<vmem>>) attributes {dimension_semantics = [#tpu.dimension_semantics<parallel>, #tpu.dimension_semantics<parallel>, #tpu.dimension_semantics<arbitrary>], iteration_bounds = array<i64: 1, 1, 1>, scalar_prefetch = 1 : i64, scratch_operands = 1 : i64, tpu.core_type = #tpu.core_type<tc>, window_params = [{transform_indices = @transform_0, window_bounds = array<i64: 8, 128>}, {transform_indices = @transform_1, window_bounds = array<i64: 128, 128>}, {transform_indices = @transform_2, window_bounds = array<i64: 1, 128>}, {transform_indices = @transform_3, window_bounds = array<i64: 8, 128>}]} {
    %c0_i32 = arith.constant 0 : i32
    %0 = arith.cmpi eq, %arg2, %c0_i32 : i32
    %1 = arith.extui %0 : i1 to i32
    %c0_i32_0 = arith.constant 0 : i32
    %2 = arith.cmpi ne, %1, %c0_i32_0 : i32
    scf.if %2 {
      %cst_10 = arith.constant 0.000000e+00 : f32
      %12 = vector.broadcast %cst_10 : f32 to vector<8x128xf32>
      %c0_11 = arith.constant 0 : index
      %c0_12 = arith.constant 0 : index
      %13 = vector.load %arg8[%c0_11, %c0_12] : memref<8x128xf32, #tpu.memory_space<vmem>>, vector<8x128xf32>
      tpu.vector_store %arg8[%c0_11, %c0_12], %12 {strides = array<i32>} : memref<8x128xf32, #tpu.memory_space<vmem>>, vector<8x128xf32>,
    } else {
    }
    %c0 = arith.constant 0 : index
    %c0_1 = arith.constant 0 : index
    %3 = vector.load %arg4[%c0, %c0_1] : memref<8x128xf32, #tpu.memory_space<vmem>>, vector<8x128xf32>
    %c0_2 = arith.constant 0 : index
    %c0_3 = arith.constant 0 : index
    %4 = vector.load %arg8[%c0_2, %c0_3] : memref<8x128xf32, #tpu.memory_space<vmem>>, vector<8x128xf32>
    %c0_4 = arith.constant 0 : index
    %c0_5 = arith.constant 0 : index
    %5 = vector.load %arg5[%c0_4, %c0_5] : memref<128x128xf32, #tpu.memory_space<vmem>>, vector<128x128xf32>
    %cst = arith.constant dense<0.000000e+00> : vector<8x128xf32>
    %6 = tpu.matmul %3, %5, %cst {dimension_numbers = #tpu.dot_dimension_numbers<[1], [1], [0], [0], [0, 0, 1, 0], [], []>, precision = #tpu.contract_precision<fp32>} : vector<8x128xf32>, vector<128x128xf32>, vector<8x128xf32> -> vector<8x128xf32>
    %7 = arith.addf %4, %6 : vector<8x128xf32>
    %c0_6 = arith.constant 0 : index
    %c0_7 = arith.constant 0 : index
    %8 = vector.load %arg8[%c0_6, %c0_7] : memref<8x128xf32, #tpu.memory_space<vmem>>, vector<8x128xf32>
    tpu.vector_store %arg8[%c0_6, %c0_7], %7 {strides = array<i32>} : memref<8x128xf32, #tpu.memory_space<vmem>>, vector<8x128xf32>,
    %c0_i32_8 = arith.constant 0 : i32
    %9 = arith.cmpi eq, %arg2, %c0_i32_8 : i32
    %10 = arith.extui %9 : i1 to i32
    %c0_i32_9 = arith.constant 0 : i32
    %11 = arith.cmpi ne, %10, %c0_i32_9 : i32
    scf.if %11 {
      %c0_10 = arith.constant 0 : index
      %c0_11 = arith.constant 0 : index
      %12 = vector.load %arg8[%c0_10, %c0_11] : memref<8x128xf32, #tpu.memory_space<vmem>>, vector<8x128xf32>
      %c0_12 = arith.constant 0 : index
      %c0_13 = arith.constant 0 : index
      %13 = vector.load %arg6[%c0_12, %c0_13] : memref<1x128xf32, #tpu.memory_space<vmem>>, vector<1x128xf32>
      %14 = vector.broadcast %13 : vector<1x128xf32> to vector<8x128xf32>
      %15 = arith.addf %12, %14 : vector<8x128xf32>
      %c0_14 = arith.constant 0 : index
      %c0_15 = arith.constant 0 : index
      %16 = vector.load %arg7[%c0_14, %c0_15] : memref<8x128xf32, #tpu.memory_space<vmem>>, vector<8x128xf32>
      tpu.vector_store %arg7[%c0_14, %c0_15], %15 {strides = array<i32>} : memref<8x128xf32, #tpu.memory_space<vmem>>, vector<8x128xf32>,
    } else {
    }
    return
  }
  func.func @transform_0(%arg0: i32, %arg1: i32, %arg2: i32, %arg3: memref<1xi32, #tpu.memory_space<smem>>) -> (i32, i32) {
    %c0_i32 = arith.constant 0 : i32
    return %arg0, %arg2 : i32, i32
  }
  func.func @transform_1(%arg0: i32, %arg1: i32, %arg2: i32, %arg3: memref<1xi32, #tpu.memory_space<smem>>) -> (i32, i32) {
    %c0_i32 = arith.constant 0 : i32
    return %arg1, %arg2 : i32, i32
  }
  func.func @transform_2(%arg0: i32, %arg1: i32, %arg2: i32, %arg3: memref<1xi32, #tpu.memory_space<smem>>) -> (i32, i32) {
    %c0_i32 = arith.constant 0 : i32
    %c0_i32_0 = arith.constant 0 : i32
    return %c0_i32, %arg1 : i32, i32
  }
  func.func @transform_3(%arg0: i32, %arg1: i32, %arg2: i32, %arg3: memref<1xi32, #tpu.memory_space<smem>>) -> (i32, i32) {
    %c0_i32 = arith.constant 0 : i32
    return %arg0, %arg1 : i32, i32
  }
}

</mosaic_0001>

<bundles_post_ra>
// kernel: tpu_custom_call.1
= control target key start
LH: loop header
LB: loop body
LE: loop exit
PB: predicated region body
PF: predicated region fallthrough
CT: control target
= control target key end

     0   :  { %10 = vsyncpa [#allocation6], 0  ;;  %s794_s0 = inlined_call_operand.<no memory space> [shape: s32[1], index: 0, kind: input, shape index: {}]   ;;  %s795_s1 = inlined_call_operand.hbm [shape: f32[8,128], index: 1, kind: input, shape index: {}]   ;;  %s796_s2 = inlined_call_operand.hbm [shape: f32[128,128], index: 2, kind: input, shape index: {}]   ;;  %s797_s3 = inlined_call_operand.vmem [shape: f32[1,128], index: 3, kind: input, shape index: {}]   ;;  %s798_s4 = inlined_call_operand.hbm [shape: f32[8,128], index: 4, kind: output, shape index: {}]  }
   0x1   :  { %11 = vsyncpa [#allocation9], 0 }
   0x2   :  { %12 = vsyncpa [#allocation7], 0  ;;  %s18_s17 = sshll.u32 %s795_s1, 4  ;;  %s525_s0 = smov [#allocation5]   ;;  %s19_s17 = int_to_ptr.hbm [resolvable:$true] %s18_s17 }
   0x3   :  { %s20_s18 = sshll.u32 %s525_s0, 4  ;;  %s28_s21 = sshll.u32 %s796_s2, 4  ;;  %s21_s18 = int_to_ptr.vmem [resolvable:$true] %s20_s18  ;;  %s29_s21 = int_to_ptr.hbm [resolvable:$true] %s28_s21 }
   0x4   :  { %23 = dma.hbm_to_vmem [thread:$0]  %s19_s17, 128, %s21_s18, [#allocation6]  }
   0x5   :  { %s526_s22 = smov [#allocation8]   ;;  %s527_s24 = smov 128  }
   0x6   :  { %s30_s23 = sshll.u32 %s526_s22, 4  ;;  %s528_s25 = smov 8   ;;  %s31_s23 = int_to_ptr.vmem [resolvable:$true] %s30_s23 }
   0x7   :  { %36 = dma.hbm_to_vmem [thread:$0]  %s29_s21, 2048, %s31_s23, [#allocation9], %s527_s24, %s527_s24, %s528_s25  }
   0x8   :  { %519 = dma.done.wait [#allocation6], 128  }
   0x9   :  { %520 = vsyncadd [#allocation6], 4294967168 }
   0xa   :  { %521 = dma.done.wait [#allocation9], 2048  }
   0xb   :  { %522 = vsyncadd [#allocation9], 4294965248  ;;  %v69_v0 = vld [vmem:[#allocation8 + $0x78] sm:$0xff]  ;;  %v68_v1 = vld [vmem:[#allocation8 + $0x70] sm:$0xff]  ;;  %s529_s26 = smov [#allocation10]   ;;  %s430_s30 = sshll.u32 %s798_s4, 4  ;;  %s431_s30 = int_to_ptr.hbm [resolvable:$true] %s430_s30 }
   0xc   :  { %v67_v2 = vld [vmem:[#allocation8 + $0x68] sm:$0xff]  ;;  %v561_v3 = vand.u32 4294901760, %v69_v0  ;;  %v563_v4 = vand.u32 4294901760, %v68_v1  ;;  %v66_v6 = vld [vmem:[#allocation8 + $0x60] sm:$0xff]  ;;  %v65_v11 = vld [vmem:[#allocation8 + $0x58] sm:$0xff]  ;;  %s428_s27 = sshll.u32 %s529_s26, 4  ;;  %s429_s27 = int_to_ptr.vmem [resolvable:$true] %s428_s27 }
   0xd   :  { %v565_v5 = vand.u32 4294901760, %v67_v2  ;;  %v574_v9 = vand.u32 4294901760, %v66_v6  ;;  %v583_v14 = vand.u32 4294901760, %v65_v11  ;;  %v64_v19 = vld [vmem:[#allocation8 + $0x50] sm:$0xff]  ;;  %v63_v26 = vld [vmem:[#allocation8 + $0x48] sm:$0xff]  ;;  %v62_v32 = vld [vmem:[#allocation8 + $0x40] sm:$0xff] }
   0xe   :  { %71 = vmatpush.xpose.msra.mxu0 %v561_v3  ;;  %v569_v7 = vsub.f32 %v69_v0, %v561_v3  ;;  %v572_v8 = vsub.f32 %v68_v1, %v563_v4  ;;  %267 = vmatpush.xpose.msra.mxu3 %v561_v3  ;;  %v598_v21 = vand.u32 4294901760, %v64_v19  ;;  %v610_v27 = vand.u32 4294901760, %v63_v26  ;;  %v61_v38 = vld [vmem:[#allocation8 + $0x38] sm:$0xff]  ;;  %v60_v44 = vld [vmem:[#allocation8 + $0x30] sm:$0xff]  ;;  %v59_v50 = vld [vmem:[#allocation8 + $0x28] sm:$0xff] }
   0xf   :  { %v577_v10 = vsub.f32 %v67_v2, %v565_v5  ;;  %v594_v18 = vsub.f32 %v66_v6, %v574_v9  ;;  %v606_v25 = vsub.f32 %v65_v11, %v583_v14  ;;  %v630_v37 = vand.u32 4294901760, %v62_v32  ;;  %v58_v56 = vld [vmem:[#allocation8 + $0x20] sm:$0xff]  ;;  %v57_v62 = vld [vmem:[#allocation8 + $0x18] sm:$0xff]  ;;  %v56_v11 = vld [vmem:[#allocation8 + $0x10] sm:$0xff] }
  0x10   :  { %v113_v12 = vand.u32 4294901760, %v569_v7  ;;  %v119_v13 = vand.u32 4294901760, %v572_v8  ;;  %214 = vmatpush.xpose.msra.mxu2 %v569_v7  ;;  %v618_v31 = vsub.f32 %v64_v19, %v598_v21  ;;  %v623_v33 = vsub.f32 %v63_v26, %v610_v27 }
  0x11   :  { %v125_v17 = vand.u32 4294901760, %v577_v10  ;;  %v131_v24 = vand.u32 4294901760, %v594_v18  ;;  %v137_v30 = vand.u32 4294901760, %v606_v25  ;;  %v639_v42 = vand.u32 4294901760, %v61_v38 }
  0x12   :  { %73 = vmatpush.xpose.msra.mxu0 %v563_v4  ;;  %v114_v15 = vsub.f32 %v569_v7, %v113_v12  ;;  %v120_v16 = vsub.f32 %v572_v8, %v119_v13  ;;  %269 = vmatpush.xpose.msra.mxu3 %v563_v4  ;;  %v143_v36 = vand.u32 4294901760, %v618_v31  ;;  %v149_v39 = vand.u32 4294901760, %v623_v33  ;;  %v52_v7 = vld [vmem:[#allocation5] sm:$0xff] }
  0x13   :  { %v126_v23 = vsub.f32 %v577_v10, %v125_v17  ;;  %v132_v29 = vsub.f32 %v594_v18, %v131_v24  ;;  %v138_v35 = vsub.f32 %v606_v25, %v137_v30  ;;  %v642_v43 = vsub.f32 %v62_v32, %v630_v37 }
  0x14   :  { %v115_v20 = vand.u32 4294901760, %v114_v15  ;;  %217 = vmatpush.xpose.msra.mxu2 %v572_v8  ;;  %v121_v22 = vand.u32 4294901760, %v120_v16  ;;  %v144_v41 = vsub.f32 %v618_v31, %v143_v36  ;;  %v150_v45 = vsub.f32 %v623_v33, %v149_v39 }
  0x15   :  { %v127_v28 = vand.u32 4294901760, %v126_v23  ;;  %v133_v34 = vand.u32 4294901760, %v132_v29  ;;  %v139_v40 = vand.u32 4294901760, %v138_v35  ;;  %v155_v47 = vand.u32 4294901760, %v642_v43  ;;  %v55_v23 = vld [vmem:[#allocation8 + $0x8] sm:$0xff]  ;;  %v54_v35 = vld [vmem:[#allocation8] sm:$0xff] }
  0x16   :  { %116 = vmatpush.xpose.msra.mxu1 %v115_v20  ;;  %75 = vmatpush.xpose.msra.mxu0 %v565_v5  ;;  %v145_v46 = vand.u32 4294901760, %v144_v41  ;;  %v651_v48 = vand.u32 4294901760, %v60_v44  ;;  %v654_v49 = vsub.f32 %v61_v38, %v639_v42  ;;  %v151_v51 = vand.u32 4294901760, %v150_v45 }
  0x17   :  { %271 = vmatpush.xpose.msra.mxu3 %v565_v5  ;;  %v156_v52 = vsub.f32 %v642_v43, %v155_v47  ;;  %v663_v54 = vand.u32 4294901760, %v59_v50  ;;  %v670_v57 = vand.u32 4294901760, %v58_v56  ;;  %v690_v6 = vand.u32 4294901760, %v57_v62 }
  0x18   :  { %220 = vmatpush.xpose.msra.mxu2 %v577_v10  ;;  %v161_v53 = vand.u32 4294901760, %v654_v49  ;;  %v666_v55 = vsub.f32 %v60_v44, %v651_v48  ;;  %v699_v20 = vand.u32 4294901760, %v56_v11  ;;  %v711_v32 = vand.u32 4294901760, %v55_v23 }
  0x19   :  { %v157_v58 = vand.u32 4294901760, %v156_v52  ;;  %v678_v61 = vsub.f32 %v59_v50, %v663_v54  ;;  %v683_v63 = vsub.f32 %v58_v56, %v670_v57  ;;  %v723_v44 = vand.u32 4294901760, %v54_v35 }
  0x1a   :  { %122 = vmatpush.xpose.msra.mxu1 %v121_v22  ;;  %77 = vmatpush.xpose.msra.mxu0 %v574_v9  ;;  %v162_v59 = vsub.f32 %v654_v49, %v161_v53  ;;  %v167_v60 = vand.u32 4294901760, %v666_v55  ;;  %v702_v22 = vsub.f32 %v57_v62, %v690_v6  ;;  %v726_v45 = vsub.f32 %v55_v23, %v711_v32 }
  0x1b   :  { %273 = vmatpush.xpose.msra.mxu3 %v574_v9  ;;  %v173_v2 = vand.u32 4294901760, %v678_v61  ;;  %v179_v15 = vand.u32 4294901760, %v683_v63  ;;  %v202_v52 = vsub.f32 %v54_v35, %v723_v44 }
  0x1c   :  { %223 = vmatpush.xpose.msra.mxu2 %v594_v18  ;;  %v163_v0 = vand.u32 4294901760, %v162_v59  ;;  %v168_v1 = vsub.f32 %v666_v55, %v167_v60  ;;  %v185_v29 = vand.u32 4294901760, %v702_v22 }
  0x1d   :  { %v174_v19 = vsub.f32 %v678_v61, %v173_v2  ;;  %v180_v26 = vsub.f32 %v683_v63, %v179_v15  ;;  %v203_v59 = vand.u32 4294901760, %v202_v52 }
  0x1e   :  { %128 = vmatpush.xpose.msra.mxu1 %v127_v28  ;;  %79 = vmatpush.xpose.msra.mxu0 %v583_v14  ;;  %v169_v16 = vand.u32 4294901760, %v168_v1 }
  0x1f   :  { %275 = vmatpush.xpose.msra.mxu3 %v583_v14  ;;  %v175_v28 = vand.u32 4294901760, %v174_v19  ;;  %v181_v38 = vand.u32 4294901760, %v180_v26 }
  0x20   :  { %226 = vmatpush.xpose.msra.mxu2 %v606_v25 }
  0x22   :  { %134 = vmatpush.xpose.msra.mxu1 %v133_v34  ;;  %81 = vmatpush.xpose.msra.mxu0 %v598_v21  ;;  %v714_v34 = vsub.f32 %v56_v11, %v699_v20 }
  0x23   :  { %277 = vmatpush.xpose.msra.mxu3 %v598_v21 }
  0x24   :  { %229 = vmatpush.xpose.msra.mxu2 %v618_v31  ;;  %v191_v41 = vand.u32 4294901760, %v714_v34 }
  0x26   :  { %140 = vmatpush.xpose.msra.mxu1 %v139_v40  ;;  %83 = vmatpush.xpose.msra.mxu0 %v610_v27  ;;  %v186_v40 = vsub.f32 %v702_v22, %v185_v29  ;;  %v192_v50 = vsub.f32 %v714_v34, %v191_v41 }
  0x27   :  { %279 = vmatpush.xpose.msra.mxu3 %v610_v27 }
  0x28   :  { %232 = vmatpush.xpose.msra.mxu2 %v623_v33  ;;  %v193_v56 = vand.u32 4294901760, %v192_v50 }
  0x2a   :  { %146 = vmatpush.xpose.msra.mxu1 %v145_v46  ;;  %85 = vmatpush.xpose.msra.mxu0 %v630_v37  ;;  %v187_v46 = vand.u32 4294901760, %v186_v40 }
  0x2b   :  { %281 = vmatpush.xpose.msra.mxu3 %v630_v37 }
  0x2c   :  { %235 = vmatpush.xpose.msra.mxu2 %v642_v43 }
  0x2e   :  { %152 = vmatpush.xpose.msra.mxu1 %v151_v51  ;;  %87 = vmatpush.xpose.msra.mxu0 %v639_v42  ;;  %v197_v51 = vand.u32 4294901760, %v726_v45 }
  0x2f   :  { %283 = vmatpush.xpose.msra.mxu3 %v639_v42 }
  0x30   :  { %238 = vmatpush.xpose.msra.mxu2 %v654_v49 }
  0x32   :  { %158 = vmatpush.xpose.msra.mxu1 %v157_v58  ;;  %89 = vmatpush.xpose.msra.mxu0 %v651_v48  ;;  %v198_v58 = vsub.f32 %v726_v45, %v197_v51 }
  0x33   :  { %285 = vmatpush.xpose.msra.mxu3 %v651_v48 }
  0x34   :  { %241 = vmatpush.xpose.msra.mxu2 %v666_v55  ;;  %v199_v62 = vand.u32 4294901760, %v198_v58 }
  0x36   :  { %164 = vmatpush.xpose.msra.mxu1 %v163_v0  ;;  %91 = vmatpush.xpose.msra.mxu0 %v663_v54  ;;  %v204_v0 = vsub.f32 %v202_v52, %v203_v59 }
  0x37   :  { %287 = vmatpush.xpose.msra.mxu3 %v663_v54 }
  0x38   :  { %244 = vmatpush.xpose.msra.mxu2 %v678_v61  ;;  %v205_v1 = vand.u32 4294901760, %v204_v0 }
  0x3a   :  { %170 = vmatpush.xpose.msra.mxu1 %v169_v16  ;;  %93 = vmatpush.xpose.msra.mxu0 %v670_v57 }
  0x3b   :  { %289 = vmatpush.xpose.msra.mxu3 %v670_v57 }
  0x3c   :  { %247 = vmatpush.xpose.msra.mxu2 %v683_v63 }
  0x3e   :  { %176 = vmatpush.xpose.msra.mxu1 %v175_v28  ;;  %95 = vmatpush.xpose.msra.mxu0 %v690_v6 }
  0x3f   :  { %291 = vmatpush.xpose.msra.mxu3 %v690_v6 }
  0x40   :  { %250 = vmatpush.xpose.msra.mxu2 %v702_v22 }
  0x42   :  { %182 = vmatpush.xpose.msra.mxu1 %v181_v38  ;;  %97 = vmatpush.xpose.msra.mxu0 %v699_v20 }
  0x43   :  { %293 = vmatpush.xpose.msra.mxu3 %v699_v20 }
  0x44   :  { %253 = vmatpush.xpose.msra.mxu2 %v714_v34 }
  0x46   :  { %188 = vmatpush.xpose.msra.mxu1 %v187_v46  ;;  %99 = vmatpush.xpose.msra.mxu0 %v711_v32 }
  0x47   :  { %295 = vmatpush.xpose.msra.mxu3 %v711_v32 }
  0x48   :  { %256 = vmatpush.xpose.msra.mxu2 %v726_v45 }
  0x4a   :  { %194 = vmatpush.xpose.msra.mxu1 %v193_v56  ;;  %101 = vmatpush.xpose.msra.mxu0 %v723_v44 }
  0x4b   :  { %297 = vmatpush.xpose.msra.mxu3 %v723_v44 }
  0x4c   :  { %259 = vmatpush.xpose.msra.mxu2 %v202_v52 }
  0x4e   :  { %308 = vmatpush.xpose.msrb.mxu0 %v113_v12  ;;  %200 = vmatpush.xpose.msra.mxu1 %v199_v62  ;;  %v102_v12 = vand.u32 4294901760, %v52_v7 }
  0x50   :  { %v103_v8 = vsub.f32 %v52_v7, %v102_v12 }
  0x52   :  { %312 = vmatpush.xpose.msrb.mxu0 %v119_v13  ;;  %206 = vmatpush.xpose.msra.mxu1 %v205_v1 }
  0x53   :  { %262 = vmatmul.f32.vlgmr.msra.gmra.mxu2 %v103_v8 }
  0x55   :  { %208 = vmatmul.f32.vlgmr.msra.gmra.mxu1 %v102_v12 }
  0x56   :  { %375 = vmatpush.xpose.msrb.mxu1 %v561_v3  ;;  %316 = vmatpush.xpose.msrb.mxu0 %v125_v17  ;;  %v104_v3 = vand.u32 4294901760, %v103_v8 }
  0x58   :  { %301 = vmatmul.f32.vlgmr.msra.gmra.mxu3 %v104_v3 }
  0x5a   :  { %377 = vmatpush.xpose.msrb.mxu1 %v563_v4  ;;  %320 = vmatpush.xpose.msrb.mxu0 %v131_v24  ;;  %v105_v4 = vsub.f32 %v103_v8, %v104_v3 }
  0x5e   :  { %379 = vmatpush.xpose.msrb.mxu1 %v565_v5  ;;  %324 = vmatpush.xpose.msrb.mxu0 %v137_v30  ;;  %v106_v5 = vand.u32 4294901760, %v105_v4 }
  0x60   :  { %107 = vmatmul.f32.vlgmr.msra.gmra.mxu0 %v106_v5 }
  0x62   :  { %381 = vmatpush.xpose.msrb.mxu1 %v574_v9  ;;  %328 = vmatpush.xpose.msrb.mxu0 %v143_v36 }
  0x66   :  { %383 = vmatpush.xpose.msrb.mxu1 %v583_v14  ;;  %332 = vmatpush.xpose.msrb.mxu0 %v149_v39 }
  0x6a   :  { %385 = vmatpush.xpose.msrb.mxu1 %v598_v21  ;;  %336 = vmatpush.xpose.msrb.mxu0 %v155_v47 }
  0x6e   :  { %387 = vmatpush.xpose.msrb.mxu1 %v610_v27  ;;  %340 = vmatpush.xpose.msrb.mxu0 %v161_v53  ;;  %v446_v27 = vld [vmem:[%s797_s3] ss:$0 sm:$0xff] }
  0x72   :  { %389 = vmatpush.xpose.msrb.mxu1 %v630_v37  ;;  %344 = vmatpush.xpose.msrb.mxu0 %v167_v60 }
  0x76   :  { %391 = vmatpush.xpose.msrb.mxu1 %v639_v42  ;;  %348 = vmatpush.xpose.msrb.mxu0 %v173_v2 }
  0x7a   :  { %393 = vmatpush.xpose.msrb.mxu1 %v651_v48  ;;  %352 = vmatpush.xpose.msrb.mxu0 %v179_v15 }
  0x7e   :  { %395 = vmatpush.xpose.msrb.mxu1 %v663_v54  ;;  %356 = vmatpush.xpose.msrb.mxu0 %v185_v29 }
  0x82   :  { %397 = vmatpush.xpose.msrb.mxu1 %v670_v57  ;;  %360 = vmatpush.xpose.msrb.mxu0 %v191_v41 }
  0x86   :  { %399 = vmatpush.xpose.msrb.mxu1 %v690_v6  ;;  %364 = vmatpush.xpose.msrb.mxu0 %v197_v51 }
  0x8a   :  { %401 = vmatpush.xpose.msrb.mxu1 %v699_v20  ;;  %368 = vmatpush.xpose.msrb.mxu0 %v203_v59 }
  0x8d   :  { %370 = vmatmul.f32.vlgmr.msrb.gmra.mxu0 %v102_v12 }
  0x8e   :  { %403 = vmatpush.xpose.msrb.mxu1 %v711_v32 }
  0x92   :  { %405 = vmatpush.xpose.msrb.mxu1 %v723_v44 }
  0x95   :  { %407 = vmatmul.f32.vlgmr.msrb.gmra.mxu1 %v102_v12 }
  0xd2   :  { %v209_v9 = vpop.f32.mrf.mxu1 }
  0xd6   :  { %v263_v14 = vpop.f32.mrf.mxu2 }
  0xdb   :  { %v302_v18 = vpop.f32.mrf.mxu3 }
  0xdd   :  { %v108_v10 = vpop.f32.mrf.mxu0 }
  0xde   :  { %v210_v13 = vadd.f32 %v209_v9, %v108_v10 }
  0xe0   :  { %v264_v17 = vadd.f32 %v263_v14, %v210_v13 }
  0xe2   :  { %v303_v21 = vadd.f32 %v302_v18, %v264_v17 }
 0x10a   :  { %v371_v24 = vpop.f32.mrf.mxu0 }
 0x10b   :  { %v372_v25 = vadd.f32 %v371_v24, %v303_v21 }
 0x112   :  { %v408_v30 = vpop.f32.mrf.mxu1 }
 0x113   :  { %v409_v31 = vadd.f32 %v408_v30, %v372_v25 }
 0x115   :  { %v421_v33 = vadd.f32 %v446_v27, %v409_v31 }
 0x117   :  { %422 = vst [vmem:[#allocation10] sm:$0xff] %v421_v33 }
 0x118   :  { %433 = dma.vmem_to_hbm [thread:$0]  %s429_s27, 128, %s431_s30, [#allocation7]  }
 0x119   :  { %523 = dma.done.wait [#allocation7], 128  }
 0x11a   :  { %524 = vsyncadd [#allocation7], 4294967168 }
 0x11b   :  { %438 = vsyncpa [#allocation6], 1 }
 0x11c   :  { %439 = vsyncpa [#allocation9], 1 }
 0x11d   :  { %440 = vsyncpa [#allocation7], 1 }

</bundles_post_ra>
